<compile_context>
chip_gen: v5e
topology: v5e:2x2
jax: 0.10.0
libtpu: 0.0.40
codegen_flags: <defaults>
</compile_context>

<pallas_src>
import jax
import jax.numpy as jnp
from jax.experimental import pallas as pl
from jax.experimental.pallas import tpu as pltpu


def _sobel_kernel(x_ref, o_ref):
    # x_ref, o_ref: (B, H, W) float32 blocks in VMEM.
    x = x_ref[...]
    B, H, W = x.shape

    zrow = jnp.zeros((B, 1, W), x.dtype)
    zcol = jnp.zeros((B, H, 1), x.dtype)

    # Zero-fill neighbour views along H (sublane axis). Shifts stay inside each
    # image slab, so images in the batch block never bleed into each other.
    up = jnp.concatenate([zrow, x[:, : H - 1, :]], axis=1)   # up[:, i, :] = x[:, i-1, :]
    dn = jnp.concatenate([x[:, 1:, :], zrow], axis=1)        # dn[:, i, :] = x[:, i+1, :]

    # Separable Sobel (cross-correlation, matching PyTorch Conv2d), factor 2 hoisted:
    #   Gx/2 = [1,2,1]^T (x) [1,0,-1]     Gy/2 = [1,0,-1]^T (x) [1,2,1]
    smooth_v = (up + dn) + 2.0 * x       # vertical [1,2,1]
    halfdiff_v = up - dn                 # vertical [1,0,-1]

    # Zero-fill neighbour views along W (lane axis).
    sv_l = jnp.concatenate([zcol, smooth_v[:, :, : W - 1]], axis=2)   # smooth_v[.., j-1]
    sv_r = jnp.concatenate([smooth_v[:, :, 1:], zcol], axis=2)        # smooth_v[.., j+1]
    hd_l = jnp.concatenate([zcol, halfdiff_v[:, :, : W - 1]], axis=2)
    hd_r = jnp.concatenate([halfdiff_v[:, :, 1:], zcol], axis=2)

    a = sv_l - sv_r                      # = gx / 2
    b = (hd_l + hd_r) + 2.0 * halfdiff_v  # = gy / 2

    # sqrt(gx^2 + gy^2) = 2 * sqrt(a^2 + b^2); sqrt goes to the EUP.
    o_ref[...] = 2.0 * jnp.sqrt(a * a + b * b)


def _pick_batch_block(n, per_image_bytes, budget_bytes=2 * 1024 * 1024):
    """Largest divisor of n whose input block stays under budget_bytes (>=1)."""
    max_b = max(1, budget_bytes // max(1, per_image_bytes))
    best = 1
    for d in range(1, n + 1):
        if n % d == 0 and d <= max_b:
            best = d
    return best


def sobel(img):
    """img: (N, 1, H, W) -> (N, 1, H, W) Sobel gradient magnitude (PyTorch `Sobel`)."""
    N, C, H, W = img.shape
    assert C == 1, "Sobel module expects a single input channel"
    x = img.reshape(N, H, W).astype(jnp.float32)   # free reshape, no extra HBM pass

    B = _pick_batch_block(N, H * W * 4)
    grid = (N // B,)
    block_bytes = B * H * W * 4

    # 2x double-buffered input + 2x double-buffered output + ~10 block-sized
    # temporaries, with headroom; clamp below v7x physical VMEM (64 MiB).
    vmem_limit = int(min(56 * 1024 * 1024, max(32 * 1024 * 1024, 16 * block_bytes)))

    out = pl.pallas_call(
        _sobel_kernel,
        out_shape=jax.ShapeDtypeStruct((N, H, W), jnp.float32),
        grid_spec=pltpu.PrefetchScalarGridSpec(
            num_scalar_prefetch=0,
            grid=grid,
            in_specs=[pl.BlockSpec((B, H, W), lambda n: (n, 0, 0))],
            out_specs=pl.BlockSpec((B, H, W), lambda n: (n, 0, 0)),
        ),
        compiler_params=pltpu.CompilerParams(
            dimension_semantics=("parallel",),
            vmem_limit_bytes=vmem_limit,
        ),
    )(x)

    return out.reshape(N, 1, H, W)


if __name__ == "__main__":
    key = jax.random.PRNGKey(0)
    N, C, H, W = 2, 1, 16, 16
    img = jax.random.normal(key, (N, C, H, W), dtype=jnp.float32)

    y = jax.block_until_ready(sobel(img))

    # Pure-JAX reference: exact PyTorch semantics (zero-pad 1, cross-correlation).
    xp = jnp.pad(img[:, 0], ((0, 0), (1, 1), (1, 1)))
    s = lambda di, dj: xp[:, di:di + H, dj:dj + W]
    gx = 2 * s(0, 0) - 2 * s(0, 2) + 4 * s(1, 0) - 4 * s(1, 2) + 2 * s(2, 0) - 2 * s(2, 2)
    gy = 2 * s(0, 0) + 4 * s(0, 1) + 2 * s(0, 2) - 2 * s(2, 0) - 4 * s(2, 1) - 2 * s(2, 2)
    ref = jnp.sqrt(gx * gx + gy * gy)[:, None]

    assert y.shape == (N, 1, H, W)
    assert jnp.allclose(y, ref, atol=1e-4, rtol=1e-4)

    print("KERNEL_OK")
</pallas_src>

<mosaic_0001>
module attributes {stable_mosaic.version = 11 : i64} {
  func.func @_sobel_kernel(%arg0: i32, %arg1: memref<2x16x16xf32, #tpu.memory_space<vmem>>, %arg2: memref<2x16x16xf32, #tpu.memory_space<vmem>>) attributes {dimension_semantics = [#tpu.dimension_semantics<parallel>], iteration_bounds = array<i64: 1>, scalar_prefetch = 0 : i64, scratch_operands = 0 : i64, tpu.core_type = #tpu.core_type<tc>, window_params = [{transform_indices = @transform_0, window_bounds = array<i64: 2, 16, 16>}, {transform_indices = @transform_1, window_bounds = array<i64: 2, 16, 16>}]} {
    %c0 = arith.constant 0 : index
    %c0_0 = arith.constant 0 : index
    %c0_1 = arith.constant 0 : index
    %0 = vector.load %arg1[%c0, %c0_0, %c0_1] : memref<2x16x16xf32, #tpu.memory_space<vmem>>, vector<2x16x16xf32>
    %cst = arith.constant 0.000000e+00 : f32
    %1 = vector.broadcast %cst : f32 to vector<2x1x16xf32>
    %cst_2 = arith.constant 0.000000e+00 : f32
    %2 = vector.broadcast %cst_2 : f32 to vector<2x16x1xf32>
    %3 = vector.extract_strided_slice %0 {offsets = [0, 0, 0], sizes = [2, 15, 16], strides = [1, 1, 1]} : vector<2x16x16xf32> to vector<2x15x16xf32>
    %4 = tpu.concatenate %1, %3 in 1 : vector<2x1x16xf32>, vector<2x15x16xf32> -> vector<2x16x16xf32>
    %5 = vector.extract_strided_slice %0 {offsets = [0, 1, 0], sizes = [2, 15, 16], strides = [1, 1, 1]} : vector<2x16x16xf32> to vector<2x15x16xf32>
    %6 = tpu.concatenate %5, %1 in 1 : vector<2x15x16xf32>, vector<2x1x16xf32> -> vector<2x16x16xf32>
    %7 = arith.addf %4, %6 : vector<2x16x16xf32>
    %cst_3 = arith.constant 2.000000e+00 : f32
    %8 = vector.broadcast %cst_3 : f32 to vector<2x16x16xf32>
    %9 = arith.mulf %8, %0 : vector<2x16x16xf32>
    %10 = arith.addf %7, %9 : vector<2x16x16xf32>
    %11 = arith.subf %4, %6 : vector<2x16x16xf32>
    %12 = vector.extract_strided_slice %10 {offsets = [0, 0, 0], sizes = [2, 16, 15], strides = [1, 1, 1]} : vector<2x16x16xf32> to vector<2x16x15xf32>
    %13 = tpu.concatenate %2, %12 in 2 : vector<2x16x1xf32>, vector<2x16x15xf32> -> vector<2x16x16xf32>
    %14 = vector.extract_strided_slice %10 {offsets = [0, 0, 1], sizes = [2, 16, 15], strides = [1, 1, 1]} : vector<2x16x16xf32> to vector<2x16x15xf32>
    %15 = tpu.concatenate %14, %2 in 2 : vector<2x16x15xf32>, vector<2x16x1xf32> -> vector<2x16x16xf32>
    %16 = vector.extract_strided_slice %11 {offsets = [0, 0, 0], sizes = [2, 16, 15], strides = [1, 1, 1]} : vector<2x16x16xf32> to vector<2x16x15xf32>
    %17 = tpu.concatenate %2, %16 in 2 : vector<2x16x1xf32>, vector<2x16x15xf32> -> vector<2x16x16xf32>
    %18 = vector.extract_strided_slice %11 {offsets = [0, 0, 1], sizes = [2, 16, 15], strides = [1, 1, 1]} : vector<2x16x16xf32> to vector<2x16x15xf32>
    %19 = tpu.concatenate %18, %2 in 2 : vector<2x16x15xf32>, vector<2x16x1xf32> -> vector<2x16x16xf32>
    %20 = arith.subf %13, %15 : vector<2x16x16xf32>
    %21 = arith.addf %17, %19 : vector<2x16x16xf32>
    %cst_4 = arith.constant 2.000000e+00 : f32
    %22 = vector.broadcast %cst_4 : f32 to vector<2x16x16xf32>
    %23 = arith.mulf %22, %11 : vector<2x16x16xf32>
    %24 = arith.addf %21, %23 : vector<2x16x16xf32>
    %25 = arith.mulf %20, %20 : vector<2x16x16xf32>
    %26 = arith.mulf %24, %24 : vector<2x16x16xf32>
    %27 = arith.addf %25, %26 : vector<2x16x16xf32>
    %28 = math.sqrt %27 : vector<2x16x16xf32>
    %cst_5 = arith.constant 2.000000e+00 : f32
    %29 = vector.broadcast %cst_5 : f32 to vector<2x16x16xf32>
    %30 = arith.mulf %29, %28 : vector<2x16x16xf32>
    %c0_6 = arith.constant 0 : index
    %c0_7 = arith.constant 0 : index
    %c0_8 = arith.constant 0 : index
    %31 = vector.load %arg2[%c0_6, %c0_7, %c0_8] : memref<2x16x16xf32, #tpu.memory_space<vmem>>, vector<2x16x16xf32>
    tpu.vector_store %arg2[%c0_6, %c0_7, %c0_8], %30 {strides = array<i32>} : memref<2x16x16xf32, #tpu.memory_space<vmem>>, vector<2x16x16xf32>,
    return
  }
  func.func @transform_0(%arg0: i32) -> (i32, i32, i32) {
    %c0_i32 = arith.constant 0 : i32
    %c0_i32_0 = arith.constant 0 : i32
    %c0_i32_1 = arith.constant 0 : i32
    return %arg0, %c0_i32, %c0_i32_0 : i32, i32, i32
  }
  func.func @transform_1(%arg0: i32) -> (i32, i32, i32) {
    %c0_i32 = arith.constant 0 : i32
    %c0_i32_0 = arith.constant 0 : i32
    %c0_i32_1 = arith.constant 0 : i32
    return %arg0, %c0_i32, %c0_i32_0 : i32, i32, i32
  }
}

</mosaic_0001>

<bundles_post_ra>
// kernel: tpu_custom_call.1
= control target key start
LH: loop header
LB: loop body
LE: loop exit
PB: predicated region body
PF: predicated region fallthrough
CT: control target
= control target key end

     0   :  { %6 = vsyncpa [#allocation3], 0  ;;  %s393_s0 = inlined_call_operand.hbm [shape: f32[2,16,16], index: 0, kind: input, shape index: {}]   ;;  %s394_s1 = inlined_call_operand.hbm [shape: f32[2,16,16], index: 1, kind: output, shape index: {}]  }
   0x1   :  { %7 = vsyncpa [#allocation4], 0  ;;  %s12_s8 = sshll.u32 %s393_s0, 4  ;;  %s319_s9 = smov [#allocation2]   ;;  %s13_s8 = int_to_ptr.hbm [resolvable:$true] %s12_s8 }
   0x2   :  { %s14_s10 = sshll.u32 %s319_s9, 4  ;;  %s320_s11 = smov 128   ;;  %s15_s10 = int_to_ptr.vmem [resolvable:$true] %s14_s10 }
   0x3   :  { %s321_s12 = smov 8  }
   0x4   :  { %20 = dma.hbm_to_vmem [thread:$0]  %s13_s8, 512, %s15_s10, [#allocation3], %s320_s11, %s320_s11, %s321_s12  }
   0x5   :  { %315 = dma.done.wait [#allocation3], 512  }
   0x6   :  { %316 = vsyncadd [#allocation3], 4294966784  ;;  %v27_v0 = vld [vmem:[#allocation2 + $0x10] sm:$0xff]  ;;  %v28_v1 = vld [vmem:[#allocation2 + $0x18] sm:$0xff]  ;;  %vm33_vm0 = vcmask 1040384   ;;  %vm46_vm1 = vcmask 1046528  }
   0x7   :  { %v25_v2 = vld [vmem:[#allocation2] sm:$0xff]  ;;  %v37_v3 = vrot.slane %v27_v0, 7  ;;  %v50_v4 = vrot.slane %v27_v0, 1  ;;  %v51_v5 = vrot.slane %v28_v1, 1  ;;  %v26_v6 = vld [vmem:[#allocation2 + $0x8] sm:$0xff]  ;;  %v38_v13 = vrot.slane %v28_v1, 7 }
   0x8   :  { %v34_v7 = vrot.slane %v25_v2, 7  ;;  %v47_v8 = vrot.slane %v25_v2, 1  ;;  %v48_v9 = vrot.slane %v26_v6, 1  ;;  %v35_v16 = vrot.slane %v26_v6, 7  ;;  %s322_s0 = smov 1   ;;  %s323_s13 = smov 127  }
   0x9   :  { %v45_v10 = vsel %vm33_vm0, 0.0, %v37_v3  ;;  %v52_v11 = vsel %vm46_vm1, %v50_v4, %v51_v5  ;;  %v39_v18 = vsel %vm33_vm0, %v37_v3, %v38_v13  ;;  %v58_v19 = vsel %vm46_vm1, %v51_v5, 0.0  ;;  %s324_s14 = smov [#allocation5]   ;;  %s240_s18 = sshll.u32 %s394_s1, 4  ;;  %s241_s18 = int_to_ptr.hbm [resolvable:$true] %s240_s18 }
   0xa   :  { %v44_v12 = vsel %vm33_vm0, 0.0, %v34_v7  ;;  %v73_v14 = vsub.f32 %v45_v10, %v52_v11  ;;  %v49_v15 = vsel %vm46_vm1, %v47_v8, %v48_v9  ;;  %v36_v20 = vsel %vm33_vm0, %v34_v7, %v35_v16  ;;  %s238_s15 = sshll.u32 %s324_s14, 4  ;;  %s239_s15 = int_to_ptr.vmem [resolvable:$true] %s238_s15 }
   0xb   :  { %v345_v17 = vsub.f32 %v44_v12, %v49_v15  ;;  %v57_v21 = vsel %vm46_vm1, %v48_v9, 0.0  ;;  %v355_v22 = vsub.f32 %v39_v18, %v58_v19  ;;  %v59_v24 = vadd.f32 %v49_v15, %v44_v12 }
   0xc   :  { %121 = vrot.lane.b32.xlu1 %v73_v14, %s322_s0  ;;  %v72_v23 = vsub.f32 %v36_v20, %v57_v21  ;;  %v63_v25 = vmul.f32 2.0, %v25_v2  ;;  %v61_v27 = vadd.f32 %v52_v11, %v45_v10  ;;  %v65_v28 = vmul.f32 2.0, %v27_v0 }
   0xd   :  { %117 = vrot.lane.b32.xlu0 %v345_v17, %s322_s0  ;;  %133 = vrot.lane.b32.xlu2 %v345_v17, %s323_s13  ;;  %v60_v29 = vadd.f32 %v57_v21, %v36_v20  ;;  %v64_v30 = vmul.f32 2.0, %v26_v6  ;;  %v62_v31 = vadd.f32 %v58_v19, %v39_v18  ;;  %v66_v32 = vmul.f32 2.0, %v28_v1 }
   0xe   :  { %v67_v26 = vadd.f32 %v63_v25, %v59_v24  ;;  %v69_v33 = vadd.f32 %v65_v28, %v61_v27  ;;  %vm108_vm2 = vcmask 121856   ;;  %vm91_vm3 = vcmask 7168  }
   0xf   :  { %v68_v34 = vadd.f32 %v64_v30, %v60_v29  ;;  %v70_v35 = vadd.f32 %v66_v32, %v62_v31  ;;  %v159_v48 = vmul.f32 2.0, %v73_v14  ;;  %v158_v62 = vmul.f32 2.0, %v72_v23 }
  0x10   :  { %v157_v2 = vmul.f32 2.0, %v345_v17  ;;  %v160_v20 = vmul.f32 2.0, %v355_v22  ;;  %vm229_vm6 = vcmask 130048  }
  0x14   :  { %123 = vrot.lane.b32.xlu1 %v355_v22, %s322_s0 }
  0x15   :  { %119 = vrot.lane.b32.xlu0 %v72_v23, %s322_s0  ;;  %135 = vrot.lane.b32.xlu2 %v72_v23, %s323_s13 }
  0x1c   :  { %139 = vrot.lane.b32.xlu1 %v355_v22, %s323_s13 }
  0x1d   :  { %137 = vrot.lane.b32.xlu0 %v73_v14, %s323_s13  ;;  %79 = vrot.lane.b32.xlu2 %v67_v26, %s322_s0 }
  0x24   :  { %83 = vrot.lane.b32.xlu1 %v69_v33, %s322_s0 }
  0x25   :  { %81 = vrot.lane.b32.xlu0 %v68_v34, %s322_s0  ;;  %85 = vrot.lane.b32.xlu2 %v70_v35, %s322_s0 }
  0x2c   :  { %98 = vrot.lane.b32.xlu1 %v68_v34, %s323_s13 }
  0x2d   :  { %96 = vrot.lane.b32.xlu0 %v67_v26, %s323_s13  ;;  %100 = vrot.lane.b32.xlu2 %v69_v33, %s323_s13 }
  0x35   :  { %102 = vrot.lane.b32.xlu0 %v70_v35, %s323_s13 }
  0x67   :  { %v134_v36 = vpop.permute.xlu2 %133 }
  0x68   :  { %v145_v58 = vsel %vm108_vm2, %v134_v36, 0.0 }
  0x6f   :  { %v136_v37 = vpop.permute.xlu2 %135 }
  0x70   :  { %v146_v54 = vsel %vm108_vm2, %v136_v37, 0.0 }
  0x77   :  { %v80_v39 = vpop.permute.xlu2 %79 }
  0x78   :  { %v92_v7 = vsel %vm91_vm3, 0.0, %v80_v39 }
  0x7e   :  { %v122_v38 = vpop.permute.xlu1 %121 }
  0x7f   :  { %v118_v40 = vpop.permute.xlu0 %117  ;;  %v86_v43 = vpop.permute.xlu2 %85  ;;  %v131_v47 = vsel %vm91_vm3, 0.0, %v122_v38 }
  0x80   :  { %v129_v59 = vsel %vm91_vm3, 0.0, %v118_v40  ;;  %v95_v29 = vsel %vm91_vm3, 0.0, %v86_v43 }
  0x81   :  { %v153_v1 = vadd.f32 %v145_v58, %v129_v59 }
  0x83   :  { %v161_v6 = vadd.f32 %v157_v2, %v153_v1 }
  0x85   :  { %v169_v18 = vmul.f32 %v161_v6, %v161_v6 }
  0x86   :  { %v124_v41 = vpop.permute.xlu1 %123 }
  0x87   :  { %v120_v42 = vpop.permute.xlu0 %119  ;;  %v101_v50 = vpop.permute.xlu2 %100  ;;  %v132_v11 = vsel %vm91_vm3, 0.0, %v124_v41 }
  0x88   :  { %v111_v51 = vsel %vm108_vm2, %v101_v50, 0.0  ;;  %v130_v55 = vsel %vm91_vm3, 0.0, %v120_v42 }
  0x89   :  { %v154_v61 = vadd.f32 %v146_v54, %v130_v55 }
  0x8b   :  { %v162_v4 = vadd.f32 %v158_v62, %v154_v61 }
  0x8d   :  { %v170_v16 = vmul.f32 %v162_v4, %v162_v4 }
  0x8e   :  { %v140_v44 = vpop.permute.xlu1 %139 }
  0x8f   :  { %v138_v45 = vpop.permute.xlu0 %137  ;;  %v148_v12 = vsel %vm108_vm2, %v140_v44, 0.0 }
  0x90   :  { %v147_v46 = vsel %vm108_vm2, %v138_v45, 0.0  ;;  %v156_v19 = vadd.f32 %v148_v12, %v132_v11 }
  0x91   :  { %v155_v49 = vadd.f32 %v147_v46, %v131_v47 }
  0x92   :  { %v164_v27 = vadd.f32 %v160_v20, %v156_v19 }
  0x93   :  { %v163_v52 = vadd.f32 %v159_v48, %v155_v49 }
  0x94   :  { %v172_v34 = vmul.f32 %v164_v27, %v164_v27 }
  0x95   :  { %v171_v63 = vmul.f32 %v163_v52, %v163_v52 }
  0x96   :  { %v84_v53 = vpop.permute.xlu1 %83 }
  0x97   :  { %v94_v56 = vsel %vm91_vm3, 0.0, %v84_v53  ;;  %v82_v57 = vpop.permute.xlu0 %81 }
  0x98   :  { %v151_v60 = vsub.f32 %v94_v56, %v111_v51  ;;  %v93_v8 = vsel %vm91_vm3, 0.0, %v82_v57 }
  0x9a   :  { %v167_v0 = vmul.f32 %v151_v60, %v151_v60 }
  0x9c   :  { %v175_v3 = vadd.f32 %v171_v63, %v167_v0 }
  0x9e   :  { %259 = vrsqrt.f32 %v175_v3  ;;  %v99_v5 = vpop.permute.xlu1 %98  ;;  %vm208_vm4 = vcmp.eq.f32.partialorder %v175_v3, inf  ;;  %v211_v43 = vand.u32 2147483648, %v175_v3  ;;  %vm210_vm5 = vcmp.eq.f32.partialorder %v175_v3, 0.0 }
  0x9f   :  { %v110_v9 = vsel %vm108_vm2, %v99_v5, 0.0  ;;  %v97_v10 = vpop.permute.xlu0 %96 }
  0xa0   :  { %v150_v13 = vsub.f32 %v93_v8, %v110_v9  ;;  %v109_v14 = vsel %vm108_vm2, %v97_v10, 0.0 }
  0xa1   :  { %v149_v15 = vsub.f32 %v92_v7, %v109_v14 }
  0xa2   :  { %v166_v17 = vmul.f32 %v150_v13, %v150_v13 }
  0xa3   :  { %v165_v21 = vmul.f32 %v149_v15, %v149_v15 }
  0xa4   :  { %v260_v23 = vpop.eup %259  ;;  %v174_v24 = vadd.f32 %v170_v16, %v166_v17 }
  0xa5   :  { %v202_v25 = vmul.f32 %v260_v23, %v175_v3  ;;  %v173_v26 = vadd.f32 %v169_v18, %v165_v21 }
  0xa6   :  { %261 = vrsqrt.f32 %v174_v24  ;;  %vm196_vm7 = vcmp.eq.f32.partialorder %v174_v24, inf  ;;  %v199_v59 = vand.u32 2147483648, %v174_v24  ;;  %vm198_vm9 = vcmp.eq.f32.partialorder %v174_v24, 0.0 }
  0xa7   :  { %263 = vrsqrt.f32 %v173_v26  ;;  %v103_v28 = vpop.permute.xlu0 %102  ;;  %v203_v31 = vmul.f32 %v260_v23, %v202_v25  ;;  %vm184_vm8 = vcmp.eq.f32.partialorder %v173_v26, inf  ;;  %v187_v61 = vand.u32 2147483648, %v173_v26 }
  0xa8   :  { %v112_v30 = vsel %vm108_vm2, %v103_v28, 0.0  ;;  %vm186_vm10 = vcmp.eq.f32.partialorder %v173_v26, 0.0 }
  0xa9   :  { %v152_v32 = vsub.f32 %v95_v29, %v112_v30  ;;  %v204_v33 = vmul.f32 0.5, %v203_v31 }
  0xab   :  { %v168_v35 = vmul.f32 %v152_v32, %v152_v32  ;;  %v205_v22 = vsub.f32 1.5, %v204_v33 }
  0xac   :  { %v262_v36 = vpop.eup %261 }
  0xad   :  { %v264_v37 = vpop.eup %263  ;;  %v190_v38 = vmul.f32 %v262_v36, %v174_v24  ;;  %v176_v39 = vadd.f32 %v172_v34, %v168_v35  ;;  %v206_v41 = vmul.f32 %v260_v23, %v205_v22 }
  0xae   :  { %v178_v40 = vmul.f32 %v264_v37, %v173_v26 }
  0xaf   :  { %265 = vrsqrt.f32 %v176_v39  ;;  %v191_v42 = vmul.f32 %v262_v36, %v190_v38  ;;  %v207_v45 = vmul.f32 %v206_v41, %v175_v3  ;;  %vm220_vm11 = vcmp.eq.f32.partialorder %v176_v39, inf }
  0xb0   :  { %v179_v44 = vmul.f32 %v264_v37, %v178_v40  ;;  %v223_v8 = vand.u32 2147483648, %v176_v39  ;;  %vm222_vm12 = vcmp.eq.f32.partialorder %v176_v39, 0.0 }
  0xb1   :  { %v192_v46 = vmul.f32 0.5, %v191_v42  ;;  %v209_v48 = vsel %vm208_vm4, %v175_v3, %v207_v45 }
  0xb2   :  { %v180_v47 = vmul.f32 0.5, %v179_v44  ;;  %v212_v50 = vsel %vm210_vm5, %v211_v43, %v209_v48 }
  0xb3   :  { %v193_v49 = vsub.f32 1.5, %v192_v46  ;;  %v227_v52 = vmul.f32 2.0, %v212_v50 }
  0xb4   :  { %v181_v51 = vsub.f32 1.5, %v180_v47 }
  0xb5   :  { %v266_v53 = vpop.eup %265  ;;  %v194_v54 = vmul.f32 %v262_v36, %v193_v49  ;;  %232 = vst.msk [vmem:[#allocation5 + $0x10] sm:$0xff] %vm229_vm6, %v227_v52 }
  0xb6   :  { %v214_v55 = vmul.f32 %v266_v53, %v176_v39  ;;  %v182_v56 = vmul.f32 %v264_v37, %v181_v51 }
  0xb7   :  { %v195_v57 = vmul.f32 %v194_v54, %v174_v24 }
  0xb8   :  { %v183_v58 = vmul.f32 %v182_v56, %v173_v26  ;;  %v215_v60 = vmul.f32 %v266_v53, %v214_v55 }
  0xb9   :  { %v197_v62 = vsel %vm196_vm7, %v174_v24, %v195_v57 }
  0xba   :  { %v185_v63 = vsel %vm184_vm8, %v173_v26, %v183_v58  ;;  %v200_v0 = vsel %vm198_vm9, %v199_v59, %v197_v62  ;;  %v216_v1 = vmul.f32 0.5, %v215_v60 }
  0xbb   :  { %v188_v2 = vsel %vm186_vm10, %v187_v61, %v185_v63  ;;  %v226_v3 = vmul.f32 2.0, %v200_v0 }
  0xbc   :  { %v217_v4 = vsub.f32 1.5, %v216_v1  ;;  %v225_v5 = vmul.f32 2.0, %v188_v2 }
  0xbd   :  { %231 = vst.msk [vmem:[#allocation5 + $0x8] sm:$0xff] %vm229_vm6, %v226_v3 }
  0xbe   :  { %v218_v6 = vmul.f32 %v266_v53, %v217_v4  ;;  %230 = vst.msk [vmem:[#allocation5] sm:$0xff] %vm229_vm6, %v225_v5 }
  0xc0   :  { %v219_v7 = vmul.f32 %v218_v6, %v176_v39 }
  0xc2   :  { %v221_v9 = vsel %vm220_vm11, %v176_v39, %v219_v7 }
  0xc3   :  { %v224_v10 = vsel %vm222_vm12, %v223_v8, %v221_v9 }
  0xc4   :  { %v228_v11 = vmul.f32 2.0, %v224_v10 }
  0xc6   :  { %233 = vst.msk [vmem:[#allocation5 + $0x18] sm:$0xff] %vm229_vm6, %v228_v11 }
  0xc7   :  { %246 = dma.vmem_to_hbm [thread:$0]  %s239_s15, 512, %s241_s18, [#allocation4], %s320_s11, %s320_s11, %s321_s12  }
  0xc8   :  { %317 = dma.done.wait [#allocation4], 512  }
  0xc9   :  { %318 = vsyncadd [#allocation4], 4294966784 }
  0xca   :  { %251 = vsyncpa [#allocation3], 1 }
  0xcb   :  { %252 = vsyncpa [#allocation4], 1 }

</bundles_post_ra>
